<compile_context>
chip_gen: v7x
topology: tpu7x:2x2x1
jax: 0.10.0
libtpu: 0.0.40
codegen_flags: <defaults>
</compile_context>

<pallas_src>
import functools

import jax
import jax.numpy as jnp
from jax.experimental import pallas as pl
from jax.experimental.pallas import tpu as pltpu

HIDDEN = 256            # per-head hidden width (matches the PyTorch module)
LOGIT_PAD = 128         # actor-logit lanes padded to a multiple of 128
NEG_BIAS = -1e30        # bias on padded logit lanes -> exp underflows to 0 (mask-free softmax)


def _round_up(v, m):
    return ((v + m - 1) // m) * m


def ppo_kernel(x_ref, w1_ref, b1_ref, w2a_ref, b2a_ref, w2c_ref, b2c_ref,
               probs_ref, value_ref, *, num_actions, hidden):
    """One batch tile: fused actor+critic MLP, in-kernel softmax, two dense outputs."""
    x = x_ref[...].astype(jnp.bfloat16)                                   # (TB, obs)

    # ----- fused layer 1: both heads in one MXU pass; bias + ReLU in f32 -----
    h = jnp.dot(x, w1_ref[...], preferred_element_type=jnp.float32)       # (TB, 2*hidden)
    h = jnp.maximum(h + b1_ref[...], 0.0)

    # ----- actor head: MXU matmul over the real 256-wide actor hidden only -----
    h_a = h[:, :hidden].astype(jnp.bfloat16)                              # (TB, hidden)
    logits = jnp.dot(h_a, w2a_ref[...],
                     preferred_element_type=jnp.float32) + b2a_ref[...]   # (TB, LOGIT_PAD)
    # Padded lanes hold -1e30 bias -> exp() is exactly 0 there; no lane mask needed.
    m = jnp.max(logits, axis=-1, keepdims=True)
    e = jnp.exp(logits - m)
    probs = e / jnp.sum(e, axis=-1, keepdims=True)                        # exact normalisation
    probs_ref[...] = probs[:, :num_actions].astype(probs_ref.dtype)

    # ----- critic head: f32 VPU multiply + XLU lane reduce (MXU stays free) -----
    h_c = h[:, hidden:]                                                   # (TB, hidden) f32
    value = jnp.sum(h_c * w2c_ref[...], axis=-1, keepdims=True) + b2c_ref[...]
    value_ref[...] = value.astype(value_ref.dtype)


def prepare_fused_params(params, obs_space, action_space, hidden=HIDDEN):
    """One-time host-side fusion / padding / bf16 cast of the PPO weights.

    params: (in, out)-layout f32 weights: w1a (obs,256) b1a (1,256) w2a (256,A)
            b2a (1,A) w1c (obs,256) b1c (1,256) w2c (256,1) b2c (1,1)
    """
    a_pad = _round_up(max(action_space, 1), LOGIT_PAD)

    # layer-1 fusion: one (obs, 512) bf16 matrix feeds both heads.
    w1 = jnp.concatenate([params["w1a"], params["w1c"]], axis=-1).astype(jnp.bfloat16)
    b1 = jnp.concatenate([params["b1a"], params["b1c"]], axis=-1).astype(jnp.float32)

    # actor layer 2: logits in lanes [0, A); padded lanes get a -1e30 bias.
    w2a = jnp.zeros((hidden, a_pad), jnp.float32)
    w2a = w2a.at[:, :action_space].set(params["w2a"]).astype(jnp.bfloat16)
    b2a = jnp.full((1, a_pad), NEG_BIAS, jnp.float32)
    b2a = b2a.at[:, :action_space].set(params["b2a"])

    # critic layer 2 stays f32: a (1, 256) row for a VPU multiply + lane reduce.
    w2c = params["w2c"].reshape(1, hidden).astype(jnp.float32)
    b2c = params["b2c"].reshape(1, 1).astype(jnp.float32)

    return dict(w1=w1, b1=b1, w2a=w2a, b2a=b2a, w2c=w2c, b2c=b2c)


def _choose_batch_tile(batch):
    """bf16-sublane aligned (16 rows); >=2 grid steps when possible (v7x megacore);
    capped at 2048 rows (VMEM-safe on v7x's 64 MiB and v5e's small scoped VMEM)."""
    b16 = _round_up(batch, 16)
    if b16 <= 16:
        return b16
    return min(2048, _round_up(b16 // 2, 16))


def ppo_forward(x, fused, action_space):
    """PPOAgent forward: returns (action_probs (B, A), value (B, 1)) in f32."""
    B, obs = x.shape
    k1 = fused["w1"].shape[1]              # 2 * hidden
    hidden = k1 // 2
    a_pad = fused["w2a"].shape[1]

    TB = _choose_batch_tile(B)
    B_pad = _round_up(B, TB)
    if B_pad != B:                         # pad batch only when needed (zero rows)
        x_in = jnp.concatenate([x, jnp.zeros((B_pad - B, obs), x.dtype)], axis=0)
    else:
        x_in = x

    cost = pl.CostEstimate(
        flops=2 * B_pad * (obs * k1 + hidden * a_pad + hidden),
        transcendentals=B_pad * a_pad,
        bytes_accessed=(B_pad * obs * x_in.dtype.itemsize
                        + obs * k1 * 2 + k1 * 4              # w1 bf16 + b1 f32
                        + hidden * a_pad * 2 + a_pad * 4     # w2a bf16 + b2a f32
                        + hidden * 4 + 4                     # w2c + b2c f32
                        + B_pad * (action_space + 1) * 4),   # probs + value writeback
    )

    probs, value = pl.pallas_call(
        functools.partial(ppo_kernel, num_actions=action_space, hidden=hidden),
        out_shape=(jax.ShapeDtypeStruct((B_pad, action_space), jnp.float32),
                   jax.ShapeDtypeStruct((B_pad, 1), jnp.float32)),
        grid=(B_pad // TB,),
        in_specs=[
            pl.BlockSpec((TB, obs), lambda i: (i, 0)),        # activations: pipelined
            pl.BlockSpec((obs, k1), lambda i: (0, 0)),        # weights/biases: resident
            pl.BlockSpec((1, k1), lambda i: (0, 0)),
            pl.BlockSpec((hidden, a_pad), lambda i: (0, 0)),
            pl.BlockSpec((1, a_pad), lambda i: (0, 0)),
            pl.BlockSpec((1, hidden), lambda i: (0, 0)),
            pl.BlockSpec((1, 1), lambda i: (0, 0)),
        ],
        out_specs=(
            pl.BlockSpec((TB, action_space), lambda i: (i, 0)),
            pl.BlockSpec((TB, 1), lambda i: (i, 0)),
        ),
        compiler_params=pltpu.CompilerParams(
            dimension_semantics=("parallel",),                # batch across v7x TCs
            vmem_limit_bytes=32 * 1024 * 1024),
        cost_estimate=cost,
    )(x_in, fused["w1"], fused["b1"], fused["w2a"], fused["b2a"],
      fused["w2c"], fused["b2c"])

    if B_pad != B:
        probs, value = probs[:B], value[:B]
    return probs, value


def init_params(key, obs_space, action_space, hidden=HIDDEN):
    """Deterministic parameter init (uniform, PyTorch-Linear-style bounds)."""
    ks = jax.random.split(key, 8)

    def linear(kw, kb, fan_in, fan_out):
        bound = 1.0 / jnp.sqrt(jnp.float32(fan_in))
        w = jax.random.uniform(kw, (fan_in, fan_out), jnp.float32, -bound, bound)
        b = jax.random.uniform(kb, (1, fan_out), jnp.float32, -bound, bound)
        return w, b

    w1a, b1a = linear(ks[0], ks[1], obs_space, hidden)
    w2a, b2a = linear(ks[2], ks[3], hidden, action_space)
    w1c, b1c = linear(ks[4], ks[5], obs_space, hidden)
    w2c, b2c = linear(ks[6], ks[7], hidden, 1)
    return dict(w1a=w1a, b1a=b1a, w2a=w2a, b2a=b2a,
                w1c=w1c, b1c=b1c, w2c=w2c, b2c=b2c)


def ppo_forward_ref(x, p):
    """Pure-JAX reference with matching bf16 rounding of MXU inputs."""
    bf = lambda a: a.astype(jnp.bfloat16).astype(jnp.float32)
    xb = bf(x)
    h_a = jnp.maximum(xb @ bf(p["w1a"]) + p["b1a"], 0.0)
    logits = bf(h_a) @ bf(p["w2a"]) + p["b2a"]
    probs = jax.nn.softmax(logits, axis=-1)
    h_c = jnp.maximum(xb @ bf(p["w1c"]) + p["b1c"], 0.0)
    value = h_c @ p["w2c"] + p["b2c"]                       # critic layer 2 stays f32
    return probs, value


if __name__ == "__main__":
    key = jax.random.PRNGKey(0)
    k_x, k_p = jax.random.split(key)

    batch, obs_space, action_space = 8, 32, 8
    x = jax.random.normal(k_x, (batch, obs_space), dtype=jnp.float32)
    params = init_params(k_p, obs_space, action_space)
    fused = prepare_fused_params(params, obs_space, action_space)

    probs, value = ppo_forward(x, fused, action_space)
    probs, value = jax.block_until_ready((probs, value))

    # sanity check against pure-JAX reference (same bf16-rounded MXU inputs)
    probs_ref, value_ref = ppo_forward_ref(x, params)
    assert probs.shape == (batch, action_space)
    assert value.shape == (batch, 1)
    assert bool(jnp.all(jnp.isfinite(probs))) and bool(jnp.all(jnp.isfinite(value)))
    assert jnp.allclose(jnp.sum(probs, axis=-1), 1.0, atol=1e-4)
    assert jnp.allclose(probs, probs_ref, atol=2e-2, rtol=2e-2)
    assert jnp.allclose(value, value_ref, atol=2e-2, rtol=2e-2)

    print("KERNEL_OK")
</pallas_src>

<mosaic_0001>
module attributes {stable_mosaic.version = 11 : i64} {
  func.func @ppo_kernel(%arg0: i32, %arg1: memref<16x32xf32, #tpu.memory_space<vmem>>, %arg2: memref<32x512xbf16, #tpu.memory_space<vmem>>, %arg3: memref<1x512xf32, #tpu.memory_space<vmem>>, %arg4: memref<256x128xbf16, #tpu.memory_space<vmem>>, %arg5: memref<1x128xf32, #tpu.memory_space<vmem>>, %arg6: memref<1x256xf32, #tpu.memory_space<vmem>>, %arg7: memref<1x1xf32, #tpu.memory_space<vmem>>, %arg8: memref<16x8xf32, #tpu.memory_space<vmem>>, %arg9: memref<16x1xf32, #tpu.memory_space<vmem>>) attributes {dimension_semantics = [#tpu.dimension_semantics<parallel>], iteration_bounds = array<i64: 1>, scalar_prefetch = 0 : i64, scratch_operands = 0 : i64, tpu.core_type = #tpu.core_type<tc>, window_params = [{transform_indices = @transform_0, window_bounds = array<i64: 16, 32>}, {pipeline_mode = #tpu.pipeline_mode<synchronous>, transform_indices = @transform_1, window_bounds = array<i64: 32, 512>}, {pipeline_mode = #tpu.pipeline_mode<synchronous>, transform_indices = @transform_2, window_bounds = array<i64: 1, 512>}, {pipeline_mode = #tpu.pipeline_mode<synchronous>, transform_indices = @transform_3, window_bounds = array<i64: 256, 128>}, {pipeline_mode = #tpu.pipeline_mode<synchronous>, transform_indices = @transform_4, window_bounds = array<i64: 1, 128>}, {pipeline_mode = #tpu.pipeline_mode<synchronous>, transform_indices = @transform_5, window_bounds = array<i64: 1, 256>}, {pipeline_mode = #tpu.pipeline_mode<synchronous>, transform_indices = @transform_6, window_bounds = array<i64: 1, 1>}, {transform_indices = @transform_7, window_bounds = array<i64: 16, 8>}, {transform_indices = @transform_8, window_bounds = array<i64: 16, 1>}]} {
    %c0 = arith.constant 0 : index
    %c0_0 = arith.constant 0 : index
    %0 = vector.load %arg1[%c0, %c0_0] : memref<16x32xf32, #tpu.memory_space<vmem>>, vector<16x32xf32>
    %1 = arith.truncf %0 : vector<16x32xf32> to vector<16x32xbf16>
    %c0_1 = arith.constant 0 : index
    %c0_2 = arith.constant 0 : index
    %2 = vector.load %arg2[%c0_1, %c0_2] : memref<32x512xbf16, #tpu.memory_space<vmem>>, vector<32x512xbf16>
    %cst = arith.constant dense<0.000000e+00> : vector<16x512xf32>
    %3 = tpu.matmul %1, %2, %cst {dimension_numbers = #tpu.dot_dimension_numbers<[1], [0], [0], [1], [0, 0, 1, 1], [], []>} : vector<16x32xbf16>, vector<32x512xbf16>, vector<16x512xf32> -> vector<16x512xf32>
    %c0_3 = arith.constant 0 : index
    %c0_4 = arith.constant 0 : index
    %4 = vector.load %arg3[%c0_3, %c0_4] : memref<1x512xf32, #tpu.memory_space<vmem>>, vector<1x512xf32>
    %5 = vector.broadcast %4 : vector<1x512xf32> to vector<16x512xf32>
    %6 = arith.addf %3, %5 : vector<16x512xf32>
    %cst_5 = arith.constant 0.000000e+00 : f32
    %7 = vector.broadcast %cst_5 : f32 to vector<16x512xf32>
    %8 = arith.maximumf %6, %7 : vector<16x512xf32>
    %9 = vector.extract_strided_slice %8 {offsets = [0, 0], sizes = [16, 256], strides = [1, 1]} : vector<16x512xf32> to vector<16x256xf32>
    %10 = arith.truncf %9 : vector<16x256xf32> to vector<16x256xbf16>
    %c0_6 = arith.constant 0 : index
    %c0_7 = arith.constant 0 : index
    %11 = vector.load %arg4[%c0_6, %c0_7] : memref<256x128xbf16, #tpu.memory_space<vmem>>, vector<256x128xbf16>
    %cst_8 = arith.constant dense<0.000000e+00> : vector<16x128xf32>
    %12 = tpu.matmul %10, %11, %cst_8 {dimension_numbers = #tpu.dot_dimension_numbers<[1], [0], [0], [1], [0, 0, 1, 1], [], []>} : vector<16x256xbf16>, vector<256x128xbf16>, vector<16x128xf32> -> vector<16x128xf32>
    %c0_9 = arith.constant 0 : index
    %c0_10 = arith.constant 0 : index
    %13 = vector.load %arg5[%c0_9, %c0_10] : memref<1x128xf32, #tpu.memory_space<vmem>>, vector<1x128xf32>
    %14 = vector.broadcast %13 : vector<1x128xf32> to vector<16x128xf32>
    %15 = arith.addf %12, %14 : vector<16x128xf32>
    %cst_11 = arith.constant dense<0xFF800000> : vector<16xf32>
    %16 = vector.multi_reduction <maximumf>, %15, %cst_11 [1] : vector<16x128xf32> to vector<16xf32>
    %17 = vector.shape_cast %16 : vector<16xf32> to vector<16x1xf32>
    %18 = vector.broadcast %17 : vector<16x1xf32> to vector<16x128xf32>
    %19 = arith.subf %15, %18 : vector<16x128xf32>
    %20 = math.exp %19 : vector<16x128xf32>
    %cst_12 = arith.constant dense<0.000000e+00> : vector<16xf32>
    %21 = vector.multi_reduction <add>, %20, %cst_12 [1] : vector<16x128xf32> to vector<16xf32>
    %22 = vector.shape_cast %21 : vector<16xf32> to vector<16x1xf32>
    %23 = vector.broadcast %22 : vector<16x1xf32> to vector<16x128xf32>
    %24 = arith.divf %20, %23 : vector<16x128xf32>
    %25 = vector.extract_strided_slice %24 {offsets = [0, 0], sizes = [16, 8], strides = [1, 1]} : vector<16x128xf32> to vector<16x8xf32>
    %c0_13 = arith.constant 0 : index
    %c0_14 = arith.constant 0 : index
    %26 = vector.load %arg8[%c0_13, %c0_14] : memref<16x8xf32, #tpu.memory_space<vmem>>, vector<16x8xf32>
    tpu.vector_store %arg8[%c0_13, %c0_14], %25 {strides = array<i32>} : memref<16x8xf32, #tpu.memory_space<vmem>>, vector<16x8xf32>,
    %27 = vector.extract_strided_slice %8 {offsets = [0, 256], sizes = [16, 256], strides = [1, 1]} : vector<16x512xf32> to vector<16x256xf32>
    %c0_15 = arith.constant 0 : index
    %c0_16 = arith.constant 0 : index
    %28 = vector.load %arg6[%c0_15, %c0_16] : memref<1x256xf32, #tpu.memory_space<vmem>>, vector<1x256xf32>
    %29 = vector.broadcast %28 : vector<1x256xf32> to vector<16x256xf32>
    %30 = arith.mulf %27, %29 : vector<16x256xf32>
    %cst_17 = arith.constant dense<0.000000e+00> : vector<16xf32>
    %31 = vector.multi_reduction <add>, %30, %cst_17 [1] : vector<16x256xf32> to vector<16xf32>
    %32 = vector.shape_cast %31 : vector<16xf32> to vector<16x1xf32>
    %c0_18 = arith.constant 0 : index
    %c0_19 = arith.constant 0 : index
    %33 = vector.load %arg7[%c0_18, %c0_19] : memref<1x1xf32, #tpu.memory_space<vmem>>, vector<1x1xf32>
    %34 = vector.broadcast %33 : vector<1x1xf32> to vector<16x1xf32>
    %35 = arith.addf %32, %34 : vector<16x1xf32>
    %c0_20 = arith.constant 0 : index
    %c0_21 = arith.constant 0 : index
    %36 = vector.load %arg9[%c0_20, %c0_21] : memref<16x1xf32, #tpu.memory_space<vmem>>, vector<16x1xf32>
    tpu.vector_store %arg9[%c0_20, %c0_21], %35 {strides = array<i32>} : memref<16x1xf32, #tpu.memory_space<vmem>>, vector<16x1xf32>,
    return
  }
  func.func @transform_0(%arg0: i32) -> (i32, i32) {
    %c0_i32 = arith.constant 0 : i32
    %c0_i32_0 = arith.constant 0 : i32
    return %arg0, %c0_i32 : i32, i32
  }
  func.func @transform_1(%arg0: i32) -> (i32, i32) {
    %c0_i32 = arith.constant 0 : i32
    %c0_i32_0 = arith.constant 0 : i32
    %c0_i32_1 = arith.constant 0 : i32
    return %c0_i32, %c0_i32_0 : i32, i32
  }
  func.func @transform_2(%arg0: i32) -> (i32, i32) {
    %c0_i32 = arith.constant 0 : i32
    %c0_i32_0 = arith.constant 0 : i32
    %c0_i32_1 = arith.constant 0 : i32
    return %c0_i32, %c0_i32_0 : i32, i32
  }
  func.func @transform_3(%arg0: i32) -> (i32, i32) {
    %c0_i32 = arith.constant 0 : i32
    %c0_i32_0 = arith.constant 0 : i32
    %c0_i32_1 = arith.constant 0 : i32
    return %c0_i32, %c0_i32_0 : i32, i32
  }
  func.func @transform_4(%arg0: i32) -> (i32, i32) {
    %c0_i32 = arith.constant 0 : i32
    %c0_i32_0 = arith.constant 0 : i32
    %c0_i32_1 = arith.constant 0 : i32
    return %c0_i32, %c0_i32_0 : i32, i32
  }
  func.func @transform_5(%arg0: i32) -> (i32, i32) {
    %c0_i32 = arith.constant 0 : i32
    %c0_i32_0 = arith.constant 0 : i32
    %c0_i32_1 = arith.constant 0 : i32
    return %c0_i32, %c0_i32_0 : i32, i32
  }
  func.func @transform_6(%arg0: i32) -> (i32, i32) {
    %c0_i32 = arith.constant 0 : i32
    %c0_i32_0 = arith.constant 0 : i32
    %c0_i32_1 = arith.constant 0 : i32
    return %c0_i32, %c0_i32_0 : i32, i32
  }
  func.func @transform_7(%arg0: i32) -> (i32, i32) {
    %c0_i32 = arith.constant 0 : i32
    %c0_i32_0 = arith.constant 0 : i32
    return %arg0, %c0_i32 : i32, i32
  }
  func.func @transform_8(%arg0: i32) -> (i32, i32) {
    %c0_i32 = arith.constant 0 : i32
    %c0_i32_0 = arith.constant 0 : i32
    return %arg0, %c0_i32 : i32, i32
  }
}

</mosaic_0001>

<bundles_post_ra>
// kernel: tpu_custom_call.1
= control target key start
LH: loop header
LB: loop body
LE: loop exit
PB: predicated region body
PF: predicated region fallthrough
CT: control target
= control target key end

     0   :  { %s769_s0 = inlined_call_operand.hbm [shape: f32[16,32], index: 0, kind: input, shape index: {}]   ;;  %s770_s1 = inlined_call_operand.hbm [shape: bf16[32,512], index: 1, kind: input, shape index: {}]   ;;  %s771_s2 = inlined_call_operand.vmem [shape: f32[1,512], index: 2, kind: input, shape index: {}]   ;;  %s772_s3 = inlined_call_operand.hbm [shape: bf16[256,128], index: 3, kind: input, shape index: {}]   ;;  %s773_s4 = inlined_call_operand.vmem [shape: f32[1,128], index: 4, kind: input, shape index: {}]   ;;  %s774_s5 = inlined_call_operand.vmem [shape: f32[1,256], index: 5, kind: input, shape index: {}]   ;;  %s775_s6 = inlined_call_operand.<no memory space> [shape: f32[1,1], index: 6, kind: input, shape index: {}]   ;;  %s776_s7 = inlined_call_operand.vmem [shape: f32[16,8], index: 7, kind: output, shape index: {0}]   ;;  %s777_s8 = inlined_call_operand.vmem [shape: f32[16,1], index: 8, kind: output, shape index: {1}]  }
   0x1   :  { %v14_v0 = vstv %s775_s6 }
   0x2   :  { %15 = vst [vmem:[#allocation2] sm:$0x1] %v14_v0 }
   0x3   :  { %16 = vsyncpa [#allocation4], 0 }
   0x4   :  { %17 = vsyncpa [#allocation6], 0  ;;  %s652_s29 = smov [#allocation5]   ;;  %s582_s11 = scalar_lea.hbm %s770_s1, 1024 }
   0x5   :  { %s35_s30 = sshll.u32 %s652_s29, 4  ;;  %p583_p0 = scmp.ne.s32.totalorder %s770_s1, %s582_s11  ;;  %s36_s30 = int_to_ptr.vmem [resolvable:$true] %s35_s30 }
   0x6   :  { %p586_p1 = scmp.lt.u32.totalorder %s582_s11, %s770_s1 }
   0x8   :  { %p588_p2 = pnand %p586_p1, %p583_p0 }
   0xa   :  { %591 = shalt.err (!%p588_p2)
}
   0xb   :  { %s592_s6 = scalar_lea.vmem %s36_s30, 1024  ;;  %p597_p4 = scmp.lt.s32.totalorder %s36_s30, %s36_s30 }
   0xc   :  { %p593_p3 = scmp.ne.s32.totalorder %s36_s30, %s592_s6  ;;  %p598_p5 = scmp.lt.s32.totalorder %s592_s6, %s592_s6 }
   0xe   :  { %p599_p6 = por %p598_p5, %p597_p4 }
  0x10   :  { %p600_p7 = pnand %p599_p6, %p593_p3 }
  0x12   :  { %603 = shalt.err (!%p600_p7)
}
  0x13   :  { %s653_s16 = smov 256   ;;  %s654_s17 = smov 16  }
  0x14   :  { %41 = dma.hbm_to_vmem [thread:$0]  %s770_s1, 1024, %s36_s30, [#allocation6], %s653_s16, %s653_s16, %s654_s17  }
  0x15   :  { %s655_s20 = smov [#allocation3]   ;;  %s604_s24 = scalar_lea.hbm %s769_s0, 256 }
  0x16   :  { %s23_s21 = sshll.u32 %s655_s20, 4  ;;  %p605_p8 = scmp.ne.s32.totalorder %s769_s0, %s604_s24  ;;  %s24_s21 = int_to_ptr.vmem [resolvable:$true] %s23_s21 }
  0x17   :  { %p608_p9 = scmp.lt.u32.totalorder %s604_s24, %s769_s0 }
  0x19   :  { %p610_p10 = pnand %p608_p9, %p605_p8 }
  0x1b   :  { %613 = shalt.err (!%p610_p10)
}
  0x1c   :  { %s614_s29 = scalar_lea.vmem %s24_s21, 256  ;;  %p619_p12 = scmp.lt.s32.totalorder %s24_s21, %s24_s21 }
  0x1d   :  { %p615_p11 = scmp.ne.s32.totalorder %s24_s21, %s614_s29  ;;  %p620_p13 = scmp.lt.s32.totalorder %s614_s29, %s614_s29 }
  0x1f   :  { %p621_p0 = por %p620_p13, %p619_p12 }
  0x21   :  { %p622_p1 = pnand %p621_p0, %p615_p11 }
  0x23   :  { %625 = shalt.err (!%p622_p1)
}
  0x24   :  { %s656_s1 = smov 128   ;;  %s657_s30 = smov 8  }
  0x25   :  { %29 = dma.hbm_to_vmem [thread:$0]  %s769_s0, 256, %s24_s21, [#allocation4], %s656_s1, %s656_s1, %s657_s30  }
  0x26   :  { %s658_s11 = smov [#allocation7]   ;;  %s626_s15 = scalar_lea.hbm %s772_s3, 2048 }
  0x27   :  { %s49_s12 = sshll.u32 %s658_s11, 4  ;;  %p627_p2 = scmp.ne.s32.totalorder %s772_s3, %s626_s15  ;;  %s50_s12 = int_to_ptr.vmem [resolvable:$true] %s49_s12 }
  0x28   :  { %p630_p3 = scmp.lt.u32.totalorder %s626_s15, %s772_s3 }
  0x2a   :  { %p632_p4 = pnand %p630_p3, %p627_p2 }
  0x2c   :  { %635 = shalt.err (!%p632_p4)
}
  0x2d   :  { %s636_s19 = scalar_lea.vmem %s50_s12, 2048  ;;  %p641_p6 = scmp.lt.s32.totalorder %s50_s12, %s50_s12 }
  0x2e   :  { %p637_p5 = scmp.ne.s32.totalorder %s50_s12, %s636_s19  ;;  %p642_p7 = scmp.lt.s32.totalorder %s636_s19, %s636_s19 }
  0x30   :  { %p643_p8 = por %p642_p7, %p641_p6 }
  0x32   :  { %p644_p9 = pnand %p643_p8, %p637_p5 }
  0x34   :  { %647 = shalt.err (!%p644_p9)
}
  0x35   :  { %s659_s0 = smov 64   ;;  %s660_s20 = smov 4  }
  0x36   :  { %55 = dma.hbm_to_vmem [thread:$0]  %s772_s3, 2048, %s50_s12, [#allocation6], %s659_s0, %s659_s0, %s660_s20  }
  0x37   :  { %648 = dma.done.wait [#allocation4], 256  }
  0x38   :  { %649 = vsyncadd [#allocation4], 4294967040 }
  0x39   :  { %650 = dma.done.wait [#allocation6], 3072  }
  0x3a   :  { %651 = vsyncadd [#allocation6], 4294964224  ;;  %v661_v1 = vmov 0   ;;  %v546_v2 = vld [vmem:[#allocation5 + $0x4] ss:$16 sps:$4 sm:$0xff]   ;;  %v73_v7 = vld [vmem:[#allocation3 + $0x8] sm:$0xff]  ;;  %v85_v29 = vlaneseq }
  0x3b   :  { %181 = vmatprep.mubr.bf16.mxu1 %v661_v1  ;;  %v548_v3 = vld [vmem:[#allocation5] ss:$16 sps:$4 sm:$0xff]   ;;  %149 = vmatprep.subr.bf16.mxu1 %v546_v2  ;;  %v549_v4 = vld [vmem:[#allocation5 + $0x24] ss:$16 sps:$4 sm:$0xff]   ;;  %v554_v11 = vld [vmem:[#allocation7 + $0x48] sm:$0xff]   ;;  %vm145_vm0 = vcmask 261120  }
  0x3c   :  { %v551_v5 = vld [vmem:[#allocation5 + $0x20] ss:$16 sps:$4 sm:$0xff]   ;;  %150 = vmatpush1.bf16.msra.mxu1 %v548_v3  ;;  %v555_v12 = vld [vmem:[#allocation7 + $0x8] sm:$0xff]   ;;  %v558_v15 = vld [vmem:[#allocation7 + $0x58] sm:$0xff]   ;;  %v86_v30 = vshrl.u32 %v85_v29, 7  ;;  %vm473_vm1 = vcmask 7168  }
  0x3d   :  { %v72_v6 = vld [vmem:[#allocation3] sm:$0xff]  ;;  %151 = vmatprep.subr.bf16.mxu1 %v549_v4  ;;  %v552_v8 = vld [vmem:[#allocation7 + $0x40] sm:$0xff]   ;;  %v559_v16 = vld [vmem:[#allocation7 + $0x18] sm:$0xff]   ;;  %vm439_vm2 = vcmask 64512  }
  0x3e   :  { %v553_v9 = vld [vmem:[#allocation7] sm:$0xff]   ;;  %v74_v10 = vpack.c.bf16 %v73_v7, %v72_v6  ;;  %514 = vmatprep.subr.bf16.mxu0 %v552_v8  ;;  %v556_v13 = vld [vmem:[#allocation7 + $0x50] sm:$0xff]   ;;  %v562_v19 = vld [vmem:[#allocation7 + $0x68] sm:$0xff]   ;;  %v87_v31 = vsub.s32 0, %v86_v30  ;;  %v91_v33 = vsub.s32 1, %v86_v30  ;;  %v95_v59 = vsub.s32 2, %v86_v30 }
  0x3f   :  { %515 = vmatpush3.bf16.msra.mxu0 %v553_v9  ;;  %v557_v14 = vld [vmem:[#allocation7 + $0x10] sm:$0xff]   ;;  %v560_v17 = vld [vmem:[#allocation7 + $0x60] sm:$0xff]   ;;  %v563_v20 = vld [vmem:[#allocation7 + $0x28] sm:$0xff]   ;;  %v99_v0 = vsub.s32 3, %v86_v30 }
  0x40   :  { %152 = vmatpush1.bf16.msra.mxu1 %v551_v5  ;;  %516 = vmatprep.subr.bf16.mxu0 %v554_v11  ;;  %v561_v18 = vld [vmem:[#allocation7 + $0x20] sm:$0xff]   ;;  %v564_v21 = vld [vmem:[#allocation7 + $0x70] sm:$0xff]   ;;  %v566_v23 = vld [vmem:[#allocation7 + $0x78] sm:$0xff]  }
  0x41   :  { %v565_v22 = vld [vmem:[#allocation7 + $0x30] sm:$0xff]   ;;  %v567_v24 = vld [vmem:[#allocation7 + $0x38] sm:$0xff]   ;;  %v496_v52 = vld [vmem:[%s773_s4] ss:$0 sm:$0xff] }
  0x42   :  { %v568_v25 = vld [vmem:[#allocation5 + $0x8] ss:$16 sps:$4 sm:$0xff]   ;;  %v570_v26 = vld [vmem:[#allocation5 + $0xc] ss:$16 sps:$4 sm:$0xff]  }
  0x43   :  { %494 = vmatmul.mubr.msk.bf16.vlgmr.msra.gmra.mrb[0].mxu1 %vm145_vm0, %v74_v10  ;;  %517 = vmatpush3.bf16.msra.mxu0 %v555_v12  ;;  %v573_v27 = vld [vmem:[#allocation5 + $0x2c] ss:$16 sps:$4 sm:$0xff]   ;;  %v571_v28 = vld [vmem:[#allocation5 + $0x28] ss:$16 sps:$4 sm:$0xff]  }
  0x44   :  { %224 = vmatprep.mubr.bf16.mxu1 %v661_v1  ;;  %518 = vmatprep.subr.bf16.mxu0 %v556_v13  ;;  %v83_v32 = vld [vmem:[%s771_s2] sm:$0xf] }
  0x45   :  { %192 = vmatprep.subr.bf16.mxu1 %v570_v26  ;;  %v88_v34 = vrot.slane %v83_v32, %v87_v31  ;;  %v92_v35 = vrot.slane %v83_v32, %v91_v33  ;;  %v96_v61 = vrot.slane %v83_v32, %v95_v59  ;;  %v442_v63 = vld [vmem:[%s774_s5] sm:$0x3]  ;;  %v100_v5 = vrot.slane %v83_v32, %v99_v0 }
  0x46   :  { %193 = vmatpush1.bf16.msra.mxu1 %v568_v25  ;;  %v447_v4 = vrot.slane %v442_v63, %v87_v31  ;;  %v451_v9 = vrot.slane %v442_v63, %v91_v33 }
  0x47   :  { %519 = vmatpush3.bf16.msra.mxu0 %v557_v14  ;;  %194 = vmatprep.subr.bf16.mxu1 %v573_v27 }
  0x48   :  { %520 = vmatprep.subr.bf16.mxu0 %v558_v15 }
  0x4a   :  { %195 = vmatpush1.bf16.msra.mxu1 %v571_v28  ;;  %v513_v28 = vld [vmem:[#allocation2] ss:$0 sm:$0xff] }
  0x4b   :  { %521 = vmatpush3.bf16.msra.mxu0 %v559_v16 }
  0x4c   :  { %522 = vmatprep.subr.bf16.mxu0 %v560_v17 }
  0x4d   :  { %495 = vmatmul.mubr.msk.bf16.vlgmr.msra.gmra.mrb[4].mxu1 %vm145_vm0, %v74_v10 }
  0x4f   :  { %523 = vmatpush3.bf16.msra.mxu0 %v561_v18 }
  0x50   :  { %524 = vmatprep.subr.bf16.mxu0 %v562_v19 }
  0x53   :  { %525 = vmatpush3.bf16.msra.mxu0 %v563_v20 }
  0x54   :  { %526 = vmatprep.subr.bf16.mxu0 %v564_v21 }
  0x57   :  { %527 = vmatpush3.bf16.msra.mxu0 %v565_v22 }
  0x58   :  { %528 = vmatprep.subr.bf16.mxu0 %v566_v23 }
  0x5b   :  { %529 = vmatpush3.bf16.msra.mxu0 %v567_v24 }
 0x116   :  { %v183_v36 = vpop.f32.mrb[0].mxu1 }
 0x117   :  { %v184_v37 = vadd.f32 %v183_v36, %v88_v34  ;;  %v185_v38 = vpop.f32.mrb[1].mxu1 }
 0x118   :  { %v186_v39 = vadd.f32 %v185_v38, %v92_v35  ;;  %v187_v40 = vpop.f32.mrb[2].mxu1 }
 0x119   :  { %v188_v41 = vadd.f32 %v187_v40, %v88_v34  ;;  %v189_v42 = vpop.f32.mrb[3].mxu1  ;;  %v235_v44 = vmax.f32 %v184_v37, 0.0 }
 0x11a   :  { %v190_v43 = vadd.f32 %v189_v42, %v92_v35  ;;  %v236_v46 = vmax.f32 %v186_v39, 0.0 }
 0x11b   :  { %v239_v45 = vmax.f32 %v188_v41, 0.0 }
 0x11c   :  { %v240_v47 = vmax.f32 %v190_v43, 0.0 }
 0x11d   :  { %v243_v48 = vpack.c.bf16 %v239_v45, %v235_v44 }
 0x11e   :  { %v244_v49 = vpack.c.bf16 %v240_v47, %v236_v46 }
 0x120   :  { %412 = vmatprep.mubr.bf16.mxu0 %v244_v49  ;;  %v226_v60 = vpop.f32.mrb[4].mxu1 }
 0x121   :  { %413 = vmatmul.mubr.bf16.vlgmr.msra.gmra.mrb[0].mxu0 %v243_v48  ;;  %v227_v62 = vadd.f32 %v226_v60, %v96_v61  ;;  %v228_v1 = vpop.f32.mrb[5].mxu1 }
 0x122   :  { %v230_v2 = vpop.f32.mrb[6].mxu1  ;;  %v229_v8 = vadd.f32 %v228_v1, %v100_v5 }
 0x123   :  { %v237_v3 = vmax.f32 %v227_v62, 0.0  ;;  %v231_v6 = vadd.f32 %v230_v2, %v96_v61  ;;  %v232_v7 = vpop.f32.mrb[7].mxu1 }
 0x124   :  { %v233_v11 = vadd.f32 %v232_v7, %v100_v5  ;;  %v238_v13 = vmax.f32 %v229_v8, 0.0 }
 0x125   :  { %v241_v10 = vmax.f32 %v231_v6, 0.0  ;;  %v454_v12 = vmul.f32 %v447_v4, %v237_v3 }
 0x126   :  { %v242_v15 = vmax.f32 %v233_v11, 0.0  ;;  %v455_v16 = vmul.f32 %v451_v9, %v238_v13 }
 0x127   :  { %v456_v14 = vmul.f32 %v447_v4, %v241_v10 }
 0x128   :  { %v457_v17 = vmul.f32 %v451_v9, %v242_v15  ;;  %v458_v18 = vadd.f32 %v455_v16, %v454_v12 }
 0x12a   :  { %v461_v19 = vadd.f32 %v457_v17, %v456_v14 }
 0x1f4   :  { %v530_v50 = vpop.f32.mrb[0].mxu0 }
 0x1f5   :  { %v531_v51 = vpop.f32.mrb[1].mxu0 }
 0x1f6   :  { %v532_v53 = vadd.f32 %v531_v51, %v530_v50  ;;  %v533_v54 = vpop.f32.mrb[2].mxu0 }
 0x1f7   :  { %v534_v55 = vpop.f32.mrb[3].mxu0 }
 0x1f8   :  { %v535_v56 = vadd.f32 %v534_v55, %v533_v54  ;;  %v415_v57 = vadd.f32 %v532_v53, %v496_v52 }
 0x1fa   :  { %421 = vmax.xlane.f32.xlu0 %v415_v57  ;;  %v418_v58 = vadd.f32 %v535_v56, %v496_v52 }
 0x1fe   :  { %423 = vmax.xlane.f32.xlu0 %v418_v58 }
 0x202   :  { %459 = vadd.xlane.f32.xlu0 %v458_v18 }
 0x287   :  { %v422_v20 = vpop.xlane.xlu0 %421 }
 0x288   :  { %v425_v21 = vsub.f32 %v415_v57, %v422_v20 }
 0x28a   :  { %v427_v22 = vmul.f32 1.442695, %v425_v21 }
 0x28b   :  { %v424_v23 = vpop.xlane.xlu0 %423 }
 0x28c   :  { %574 = vpow2.f32 %v427_v22  ;;  %v426_v24 = vsub.f32 %v418_v58, %v424_v23 }
 0x28e   :  { %v429_v25 = vmul.f32 1.442695, %v426_v24 }
 0x28f   :  { %v460_v29 = vpop.xlane.xlu0 %459 }
 0x290   :  { %576 = vpow2.f32 %v429_v25  ;;  %v471_v30 = vadd.f32 %v513_v28, %v460_v29 }
 0x292   :  { %474 = vst.msk [vmem:[%s777_s8] sm:$0xff] %vm473_vm1, %v471_v30 }
 0x296   :  { %v575_v26 = vpop.eup %574 }
 0x297   :  { %431 = vadd.xlane.f32.xlu1 %v575_v26 }
 0x29a   :  { %v577_v27 = vpop.eup %576 }
 0x29b   :  { %433 = vadd.xlane.f32.xlu1 %v577_v27 }
 0x29f   :  { %462 = vadd.xlane.f32.xlu1 %v461_v19 }
 0x324   :  { %v432_v31 = vpop.xlane.xlu1 %431 }
 0x325   :  { %578 = vrcp.f32 %v432_v31 }
 0x328   :  { %v434_v32 = vpop.xlane.xlu1 %433 }
 0x329   :  { %580 = vrcp.f32 %v434_v32 }
 0x32c   :  { %v463_v33 = vpop.xlane.xlu1 %462 }
 0x32d   :  { %v472_v34 = vadd.f32 %v513_v28, %v463_v33 }
 0x32f   :  { %v579_v35 = vpop.eup %578  ;;  %475 = vst.msk [vmem:[%s777_s8 + $0x8] sm:$0xff] %vm473_vm1, %v472_v34 }
 0x330   :  { %v436_v36 = vmul.f32 %v579_v35, %v575_v26 }
 0x332   :  { %440 = vst.msk [vmem:[%s776_s7] sm:$0xff] %vm439_vm2, %v436_v36 }
 0x333   :  { %v581_v37 = vpop.eup %580 }
 0x334   :  { %v438_v38 = vmul.f32 %v581_v37, %v577_v27 }
 0x336   :  { %441 = vst.msk [vmem:[%s776_s7 + $0x8] sm:$0xff] %vm439_vm2, %v438_v38 }
 0x337   :  { %484 = vsyncpa [#allocation4], 1 }
 0x338   :  { %485 = vsyncpa [#allocation6], 1 }

</bundles_post_ra>
